<compile_context>
chip_gen: v7x
topology: tpu7x:2x2x1
jax: 0.10.0
libtpu: 0.0.40
codegen_flags: <defaults>
</compile_context>

<pallas_src>
import jax
import jax.numpy as jnp
from jax.experimental import pallas as pl
from jax.experimental.pallas import tpu as pltpu


def _skipgram_kernel(tgt_t_ref, ctx_tab_ref, cen_idx_ref, ctx_idx_ref, out_ref):
    # tgt_t_ref  : (D, V)   target table, pre-transposed (embedding dim on sublanes)
    # ctx_tab_ref: (V, D)   context table
    # cen_idx_ref: (1, Bt)  int32 center word ids (batch on the lane axis)
    # ctx_idx_ref: (K, Bt)  int32 [positive || negative] context ids
    # out_ref    : (K, Bt)  f32 scores (lane-dense; positive rows first)
    V = ctx_tab_ref.shape[0]
    K, Bt = out_ref.shape

    v_iota = jax.lax.broadcasted_iota(jnp.int32, (V, Bt), 0)

    # Fused center-embedding gather: one-hot(center) @ table on the MXU.
    onehot_c = (cen_idx_ref[...] == v_iota).astype(jnp.float32)        # (V, Bt)
    center_emb = jnp.dot(tgt_t_ref[...], onehot_c,
                         preferred_element_type=jnp.float32)           # (D, Bt)

    # Score of each center word against every vocab row (contraction over D on MXU).
    proj = jnp.dot(ctx_tab_ref[...], center_emb,
                   preferred_element_type=jnp.float32)                 # (V, Bt)

    # Fused context gather: pick proj[ctx_idx[k, b], b] per (k, b) via mask +
    # sublane reduce.  K = P + N is small and static -> unrolled loop; each row
    # store is a lane-dense (1, Bt) write into the output block.
    for k in range(K):
        sel = ctx_idx_ref[pl.ds(k, 1), :] == v_iota                    # (V, Bt)
        out_ref[pl.ds(k, 1), :] = jnp.sum(
            jnp.where(sel, proj, 0.0), axis=0, keepdims=True)


def skipgram_scores(tgt_table, ctx_table, center, ctx_idx, *, batch_tile=2048):
    """tgt_table (V, D), ctx_table (V, D), center (B,), ctx_idx (B, K) int.
    Returns scores (B, K) f32 with scores[b, k] = <ctx_table[ctx_idx[b, k]], tgt_table[center[b]]>."""
    V, D = tgt_table.shape
    B, K = ctx_idx.shape

    table_bytes = V * D * jnp.dtype(tgt_table.dtype).itemsize
    if table_bytes > (4 << 20):
        # TODO(synk): large-vocab path — keep tables in HBM (memory_space=pl.ANY)
        # with scalar-prefetched index tables + per-row make_async_copy gathers.
        raise NotImplementedError("vocab table too large for the VMEM-resident fused-gather kernel")

    if B <= batch_tile:
        Bt = B                                   # single full-extent tile (always legal)
    else:
        Bt = max((batch_tile // 128) * 128, 128)  # lane-dense tiles: multiple of 128
    num_tiles = pl.cdiv(B, Bt)

    # Batch-on-lane layout (layout plumbing only; these arrays are tiny).
    center_row = center.astype(jnp.int32).reshape(1, B)     # (1, B)
    ctx_rows = ctx_idx.astype(jnp.int32).T                   # (K, B)
    tgt_t = tgt_table.T                                       # (D, V)

    # VMEM budget from (8,128)-padded tile sizes; capped at 48 MiB for v7x headroom.
    def _pad(sub, lane, itemsize):
        return (pl.cdiv(sub, 8) * 8) * (pl.cdiv(lane, 128) * 128) * itemsize

    tile_in = 2 * (_pad(1, Bt, 4) + _pad(K, Bt, 4))      # double-buffered index tiles
    tile_out = 2 * _pad(K, Bt, 4)                        # double-buffered score tile
    tables = 2 * (_pad(D, V, 4) + _pad(V, D, 4))         # resident table buffers
    scratch = 8 * _pad(V, Bt, 4)                         # onehot/proj/select intermediates (generous)
    vmem_bytes = int(min(max(tile_in + tile_out + tables + scratch + (4 << 20),
                             16 << 20), 48 << 20))

    out_t = pl.pallas_call(
        _skipgram_kernel,
        out_shape=jax.ShapeDtypeStruct((K, B), jnp.float32),
        grid_spec=pltpu.PrefetchScalarGridSpec(
            num_scalar_prefetch=0,
            grid=(num_tiles,),
            in_specs=[
                pl.BlockSpec((D, V), lambda i: (0, 0)),    # target table (transposed), fetched once
                pl.BlockSpec((V, D), lambda i: (0, 0)),    # context table, fetched once
                pl.BlockSpec((1, Bt), lambda i: (0, i)),   # center ids, batch on lanes
                pl.BlockSpec((K, Bt), lambda i: (0, i)),   # pos||neg context ids
            ],
            out_specs=pl.BlockSpec((K, Bt), lambda i: (0, i)),
        ),
        compiler_params=pltpu.CompilerParams(
            dimension_semantics=("parallel",),             # batch tiles shard across TCs
            vmem_limit_bytes=vmem_bytes,
        ),
    )(tgt_t, ctx_table, center_row, ctx_rows)

    return out_t.T                                         # (B, K)


def skipgram_ns_forward(params, center, positive, negative, *, batch_tile=2048):
    """Matches Skipgram_NS.forward: returns (positive_score (B,P), negative_score (B,N))."""
    P = positive.shape[1]
    ctx_idx = jnp.concatenate([positive, negative], axis=1)   # single fused context stream
    scores = skipgram_scores(params["target_embeddings"], params["context_embeddings"],
                             center, ctx_idx, batch_tile=batch_tile)
    return scores[:, :P], scores[:, P:]


def xavier_uniform(key, shape):
    fan_in, fan_out = shape[1], shape[0]  # matches torch Embedding weight (vocab, dim)
    bound = jnp.sqrt(6.0 / (fan_in + fan_out))
    return jax.random.uniform(key, shape, jnp.float32, -bound, bound)


if __name__ == "__main__":
    vocab_size = 64
    embedding_dim = 32
    B, P, N = 2, 4, 8

    key = jax.random.PRNGKey(0)
    k_tgt, k_ctx, k_c, k_p, k_n = jax.random.split(key, 5)

    params = {
        "target_embeddings": xavier_uniform(k_tgt, (vocab_size, embedding_dim)),
        "context_embeddings": xavier_uniform(k_ctx, (vocab_size, embedding_dim)),
    }

    center = jax.random.randint(k_c, (B,), 0, vocab_size, dtype=jnp.int32)
    positive = jax.random.randint(k_p, (B, P), 0, vocab_size, dtype=jnp.int32)
    negative = jax.random.randint(k_n, (B, N), 0, vocab_size, dtype=jnp.int32)

    # ---- small-batch path (single full-extent tile) ----
    pos_score, neg_score = skipgram_ns_forward(params, center, positive, negative)
    jax.block_until_ready((pos_score, neg_score))

    hi = jax.lax.Precision.HIGHEST
    c_emb = jnp.take(params["target_embeddings"], center, axis=0)
    p_emb = jnp.take(params["context_embeddings"], positive, axis=0)
    n_emb = jnp.take(params["context_embeddings"], negative, axis=0)
    pos_ref = jnp.einsum("bpd,bd->bp", p_emb, c_emb, precision=hi)
    neg_ref = jnp.einsum("bnd,bd->bn", n_emb, c_emb, precision=hi)
    assert pos_score.shape == (B, P) and neg_score.shape == (B, N)
    assert jnp.allclose(pos_score, pos_ref, atol=1e-3)
    assert jnp.allclose(neg_score, neg_ref, atol=1e-3)

    # ---- larger batch: multi-step parallel grid + masked partial trailing tile ----
    Bl = 2560   # batch_tile=2048 -> 2 grid steps (full tile + partial 512-row tile)
    kc2, kp2, kn2 = jax.random.split(jax.random.PRNGKey(1), 3)
    center_l = jax.random.randint(kc2, (Bl,), 0, vocab_size, dtype=jnp.int32)
    positive_l = jax.random.randint(kp2, (Bl, P), 0, vocab_size, dtype=jnp.int32)
    negative_l = jax.random.randint(kn2, (Bl, N), 0, vocab_size, dtype=jnp.int32)
    pos_l, neg_l = skipgram_ns_forward(params, center_l, positive_l, negative_l)
    jax.block_until_ready((pos_l, neg_l))

    c_l = jnp.take(params["target_embeddings"], center_l, axis=0)
    p_l = jnp.take(params["context_embeddings"], positive_l, axis=0)
    n_l = jnp.take(params["context_embeddings"], negative_l, axis=0)
    assert jnp.allclose(pos_l, jnp.einsum("bpd,bd->bp", p_l, c_l, precision=hi), atol=1e-3)
    assert jnp.allclose(neg_l, jnp.einsum("bnd,bd->bn", n_l, c_l, precision=hi), atol=1e-3)

    print("KERNEL_OK")
</pallas_src>

<mosaic_0001>
module attributes {stable_mosaic.version = 11 : i64} {
  func.func @_skipgram_kernel(%arg0: i32, %arg1: memref<32x64xf32, #tpu.memory_space<vmem>>, %arg2: memref<64x32xf32, #tpu.memory_space<vmem>>, %arg3: memref<1x2xi32, #tpu.memory_space<vmem>>, %arg4: memref<12x2xi32, #tpu.memory_space<vmem>>, %arg5: memref<12x2xf32, #tpu.memory_space<vmem>>) attributes {dimension_semantics = [#tpu.dimension_semantics<parallel>], iteration_bounds = array<i64: 1>, scalar_prefetch = 0 : i64, scratch_operands = 0 : i64, tpu.core_type = #tpu.core_type<tc>, window_params = [{pipeline_mode = #tpu.pipeline_mode<synchronous>, transform_indices = @transform_0, window_bounds = array<i64: 32, 64>}, {pipeline_mode = #tpu.pipeline_mode<synchronous>, transform_indices = @transform_1, window_bounds = array<i64: 64, 32>}, {transform_indices = @transform_2, window_bounds = array<i64: 1, 2>}, {transform_indices = @transform_3, window_bounds = array<i64: 12, 2>}, {transform_indices = @transform_4, window_bounds = array<i64: 12, 2>}]} {
    %0 = tpu.iota {dimensions = array<i32: 0>} : vector<64x2xi32>
    %c0 = arith.constant 0 : index
    %c0_0 = arith.constant 0 : index
    %1 = vector.load %arg3[%c0, %c0_0] : memref<1x2xi32, #tpu.memory_space<vmem>>, vector<1x2xi32>
    %2 = vector.broadcast %1 : vector<1x2xi32> to vector<64x2xi32>
    %3 = arith.cmpi eq, %2, %0 : vector<64x2xi32>
    %4 = arith.extui %3 : vector<64x2xi1> to vector<64x2xi32>
    %5 = arith.sitofp %4 : vector<64x2xi32> to vector<64x2xf32>
    %c0_1 = arith.constant 0 : index
    %c0_2 = arith.constant 0 : index
    %6 = vector.load %arg1[%c0_1, %c0_2] : memref<32x64xf32, #tpu.memory_space<vmem>>, vector<32x64xf32>
    %cst = arith.constant dense<0.000000e+00> : vector<32x2xf32>
    %7 = tpu.matmul %6, %5, %cst {dimension_numbers = #tpu.dot_dimension_numbers<[1], [0], [0], [1], [0, 0, 1, 1], [], []>} : vector<32x64xf32>, vector<64x2xf32>, vector<32x2xf32> -> vector<32x2xf32>
    %c0_3 = arith.constant 0 : index
    %c0_4 = arith.constant 0 : index
    %8 = vector.load %arg2[%c0_3, %c0_4] : memref<64x32xf32, #tpu.memory_space<vmem>>, vector<64x32xf32>
    %cst_5 = arith.constant dense<0.000000e+00> : vector<64x2xf32>
    %9 = tpu.matmul %8, %7, %cst_5 {dimension_numbers = #tpu.dot_dimension_numbers<[1], [0], [0], [1], [0, 0, 1, 1], [], []>} : vector<64x32xf32>, vector<32x2xf32>, vector<64x2xf32> -> vector<64x2xf32>
    %c0_6 = arith.constant 0 : index
    %c0_7 = arith.constant 0 : index
    %10 = vector.load %arg4[%c0_6, %c0_7] : memref<12x2xi32, #tpu.memory_space<vmem>>, vector<1x2xi32>
    %11 = vector.broadcast %10 : vector<1x2xi32> to vector<64x2xi32>
    %12 = arith.cmpi eq, %11, %0 : vector<64x2xi32>
    %cst_8 = arith.constant 0.000000e+00 : f32
    %13 = vector.broadcast %cst_8 : f32 to vector<64x2xf32>
    %14 = arith.select %12, %9, %13 : vector<64x2xi1>, vector<64x2xf32>
    %cst_9 = arith.constant dense<0.000000e+00> : vector<2xf32>
    %15 = vector.multi_reduction <add>, %14, %cst_9 [0] : vector<64x2xf32> to vector<2xf32>
    %16 = vector.shape_cast %15 : vector<2xf32> to vector<1x2xf32>
    %c0_10 = arith.constant 0 : index
    %c0_11 = arith.constant 0 : index
    %17 = vector.load %arg5[%c0_10, %c0_11] : memref<12x2xf32, #tpu.memory_space<vmem>>, vector<1x2xf32>
    tpu.vector_store %arg5[%c0_10, %c0_11], %16 {strides = array<i32>} : memref<12x2xf32, #tpu.memory_space<vmem>>, vector<1x2xf32>,
    %c1 = arith.constant 1 : index
    %c0_12 = arith.constant 0 : index
    %18 = vector.load %arg4[%c1, %c0_12] : memref<12x2xi32, #tpu.memory_space<vmem>>, vector<1x2xi32>
    %19 = vector.broadcast %18 : vector<1x2xi32> to vector<64x2xi32>
    %20 = arith.cmpi eq, %19, %0 : vector<64x2xi32>
    %cst_13 = arith.constant 0.000000e+00 : f32
    %21 = vector.broadcast %cst_13 : f32 to vector<64x2xf32>
    %22 = arith.select %20, %9, %21 : vector<64x2xi1>, vector<64x2xf32>
    %cst_14 = arith.constant dense<0.000000e+00> : vector<2xf32>
    %23 = vector.multi_reduction <add>, %22, %cst_14 [0] : vector<64x2xf32> to vector<2xf32>
    %24 = vector.shape_cast %23 : vector<2xf32> to vector<1x2xf32>
    %c1_15 = arith.constant 1 : index
    %c0_16 = arith.constant 0 : index
    %25 = vector.load %arg5[%c1_15, %c0_16] : memref<12x2xf32, #tpu.memory_space<vmem>>, vector<1x2xf32>
    tpu.vector_store %arg5[%c1_15, %c0_16], %24 {strides = array<i32>} : memref<12x2xf32, #tpu.memory_space<vmem>>, vector<1x2xf32>,
    %c2 = arith.constant 2 : index
    %c0_17 = arith.constant 0 : index
    %26 = vector.load %arg4[%c2, %c0_17] : memref<12x2xi32, #tpu.memory_space<vmem>>, vector<1x2xi32>
    %27 = vector.broadcast %26 : vector<1x2xi32> to vector<64x2xi32>
    %28 = arith.cmpi eq, %27, %0 : vector<64x2xi32>
    %cst_18 = arith.constant 0.000000e+00 : f32
    %29 = vector.broadcast %cst_18 : f32 to vector<64x2xf32>
    %30 = arith.select %28, %9, %29 : vector<64x2xi1>, vector<64x2xf32>
    %cst_19 = arith.constant dense<0.000000e+00> : vector<2xf32>
    %31 = vector.multi_reduction <add>, %30, %cst_19 [0] : vector<64x2xf32> to vector<2xf32>
    %32 = vector.shape_cast %31 : vector<2xf32> to vector<1x2xf32>
    %c2_20 = arith.constant 2 : index
    %c0_21 = arith.constant 0 : index
    %33 = vector.load %arg5[%c2_20, %c0_21] : memref<12x2xf32, #tpu.memory_space<vmem>>, vector<1x2xf32>
    tpu.vector_store %arg5[%c2_20, %c0_21], %32 {strides = array<i32>} : memref<12x2xf32, #tpu.memory_space<vmem>>, vector<1x2xf32>,
    %c3 = arith.constant 3 : index
    %c0_22 = arith.constant 0 : index
    %34 = vector.load %arg4[%c3, %c0_22] : memref<12x2xi32, #tpu.memory_space<vmem>>, vector<1x2xi32>
    %35 = vector.broadcast %34 : vector<1x2xi32> to vector<64x2xi32>
    %36 = arith.cmpi eq, %35, %0 : vector<64x2xi32>
    %cst_23 = arith.constant 0.000000e+00 : f32
    %37 = vector.broadcast %cst_23 : f32 to vector<64x2xf32>
    %38 = arith.select %36, %9, %37 : vector<64x2xi1>, vector<64x2xf32>
    %cst_24 = arith.constant dense<0.000000e+00> : vector<2xf32>
    %39 = vector.multi_reduction <add>, %38, %cst_24 [0] : vector<64x2xf32> to vector<2xf32>
    %40 = vector.shape_cast %39 : vector<2xf32> to vector<1x2xf32>
    %c3_25 = arith.constant 3 : index
    %c0_26 = arith.constant 0 : index
    %41 = vector.load %arg5[%c3_25, %c0_26] : memref<12x2xf32, #tpu.memory_space<vmem>>, vector<1x2xf32>
    tpu.vector_store %arg5[%c3_25, %c0_26], %40 {strides = array<i32>} : memref<12x2xf32, #tpu.memory_space<vmem>>, vector<1x2xf32>,
    %c4 = arith.constant 4 : index
    %c0_27 = arith.constant 0 : index
    %42 = vector.load %arg4[%c4, %c0_27] : memref<12x2xi32, #tpu.memory_space<vmem>>, vector<1x2xi32>
    %43 = vector.broadcast %42 : vector<1x2xi32> to vector<64x2xi32>
    %44 = arith.cmpi eq, %43, %0 : vector<64x2xi32>
    %cst_28 = arith.constant 0.000000e+00 : f32
    %45 = vector.broadcast %cst_28 : f32 to vector<64x2xf32>
    %46 = arith.select %44, %9, %45 : vector<64x2xi1>, vector<64x2xf32>
    %cst_29 = arith.constant dense<0.000000e+00> : vector<2xf32>
    %47 = vector.multi_reduction <add>, %46, %cst_29 [0] : vector<64x2xf32> to vector<2xf32>
    %48 = vector.shape_cast %47 : vector<2xf32> to vector<1x2xf32>
    %c4_30 = arith.constant 4 : index
    %c0_31 = arith.constant 0 : index
    %49 = vector.load %arg5[%c4_30, %c0_31] : memref<12x2xf32, #tpu.memory_space<vmem>>, vector<1x2xf32>
    tpu.vector_store %arg5[%c4_30, %c0_31], %48 {strides = array<i32>} : memref<12x2xf32, #tpu.memory_space<vmem>>, vector<1x2xf32>,
    %c5 = arith.constant 5 : index
    %c0_32 = arith.constant 0 : index
    %50 = vector.load %arg4[%c5, %c0_32] : memref<12x2xi32, #tpu.memory_space<vmem>>, vector<1x2xi32>
    %51 = vector.broadcast %50 : vector<1x2xi32> to vector<64x2xi32>
    %52 = arith.cmpi eq, %51, %0 : vector<64x2xi32>
    %cst_33 = arith.constant 0.000000e+00 : f32
    %53 = vector.broadcast %cst_33 : f32 to vector<64x2xf32>
    %54 = arith.select %52, %9, %53 : vector<64x2xi1>, vector<64x2xf32>
    %cst_34 = arith.constant dense<0.000000e+00> : vector<2xf32>
    %55 = vector.multi_reduction <add>, %54, %cst_34 [0] : vector<64x2xf32> to vector<2xf32>
    %56 = vector.shape_cast %55 : vector<2xf32> to vector<1x2xf32>
    %c5_35 = arith.constant 5 : index
    %c0_36 = arith.constant 0 : index
    %57 = vector.load %arg5[%c5_35, %c0_36] : memref<12x2xf32, #tpu.memory_space<vmem>>, vector<1x2xf32>
    tpu.vector_store %arg5[%c5_35, %c0_36], %56 {strides = array<i32>} : memref<12x2xf32, #tpu.memory_space<vmem>>, vector<1x2xf32>,
    %c6 = arith.constant 6 : index
    %c0_37 = arith.constant 0 : index
    %58 = vector.load %arg4[%c6, %c0_37] : memref<12x2xi32, #tpu.memory_space<vmem>>, vector<1x2xi32>
    %59 = vector.broadcast %58 : vector<1x2xi32> to vector<64x2xi32>
    %60 = arith.cmpi eq, %59, %0 : vector<64x2xi32>
    %cst_38 = arith.constant 0.000000e+00 : f32
    %61 = vector.broadcast %cst_38 : f32 to vector<64x2xf32>
    %62 = arith.select %60, %9, %61 : vector<64x2xi1>, vector<64x2xf32>
    %cst_39 = arith.constant dense<0.000000e+00> : vector<2xf32>
    %63 = vector.multi_reduction <add>, %62, %cst_39 [0] : vector<64x2xf32> to vector<2xf32>
    %64 = vector.shape_cast %63 : vector<2xf32> to vector<1x2xf32>
    %c6_40 = arith.constant 6 : index
    %c0_41 = arith.constant 0 : index
    %65 = vector.load %arg5[%c6_40, %c0_41] : memref<12x2xf32, #tpu.memory_space<vmem>>, vector<1x2xf32>
    tpu.vector_store %arg5[%c6_40, %c0_41], %64 {strides = array<i32>} : memref<12x2xf32, #tpu.memory_space<vmem>>, vector<1x2xf32>,
    %c7 = arith.constant 7 : index
    %c0_42 = arith.constant 0 : index
    %66 = vector.load %arg4[%c7, %c0_42] : memref<12x2xi32, #tpu.memory_space<vmem>>, vector<1x2xi32>
    %67 = vector.broadcast %66 : vector<1x2xi32> to vector<64x2xi32>
    %68 = arith.cmpi eq, %67, %0 : vector<64x2xi32>
    %cst_43 = arith.constant 0.000000e+00 : f32
    %69 = vector.broadcast %cst_43 : f32 to vector<64x2xf32>
    %70 = arith.select %68, %9, %69 : vector<64x2xi1>, vector<64x2xf32>
    %cst_44 = arith.constant dense<0.000000e+00> : vector<2xf32>
    %71 = vector.multi_reduction <add>, %70, %cst_44 [0] : vector<64x2xf32> to vector<2xf32>
    %72 = vector.shape_cast %71 : vector<2xf32> to vector<1x2xf32>
    %c7_45 = arith.constant 7 : index
    %c0_46 = arith.constant 0 : index
    %73 = vector.load %arg5[%c7_45, %c0_46] : memref<12x2xf32, #tpu.memory_space<vmem>>, vector<1x2xf32>
    tpu.vector_store %arg5[%c7_45, %c0_46], %72 {strides = array<i32>} : memref<12x2xf32, #tpu.memory_space<vmem>>, vector<1x2xf32>,
    %c8 = arith.constant 8 : index
    %c0_47 = arith.constant 0 : index
    %74 = vector.load %arg4[%c8, %c0_47] : memref<12x2xi32, #tpu.memory_space<vmem>>, vector<1x2xi32>
    %75 = vector.broadcast %74 : vector<1x2xi32> to vector<64x2xi32>
    %76 = arith.cmpi eq, %75, %0 : vector<64x2xi32>
    %cst_48 = arith.constant 0.000000e+00 : f32
    %77 = vector.broadcast %cst_48 : f32 to vector<64x2xf32>
    %78 = arith.select %76, %9, %77 : vector<64x2xi1>, vector<64x2xf32>
    %cst_49 = arith.constant dense<0.000000e+00> : vector<2xf32>
    %79 = vector.multi_reduction <add>, %78, %cst_49 [0] : vector<64x2xf32> to vector<2xf32>
    %80 = vector.shape_cast %79 : vector<2xf32> to vector<1x2xf32>
    %c8_50 = arith.constant 8 : index
    %c0_51 = arith.constant 0 : index
    %81 = vector.load %arg5[%c8_50, %c0_51] : memref<12x2xf32, #tpu.memory_space<vmem>>, vector<1x2xf32>
    tpu.vector_store %arg5[%c8_50, %c0_51], %80 {strides = array<i32>} : memref<12x2xf32, #tpu.memory_space<vmem>>, vector<1x2xf32>,
    %c9 = arith.constant 9 : index
    %c0_52 = arith.constant 0 : index
    %82 = vector.load %arg4[%c9, %c0_52] : memref<12x2xi32, #tpu.memory_space<vmem>>, vector<1x2xi32>
    %83 = vector.broadcast %82 : vector<1x2xi32> to vector<64x2xi32>
    %84 = arith.cmpi eq, %83, %0 : vector<64x2xi32>
    %cst_53 = arith.constant 0.000000e+00 : f32
    %85 = vector.broadcast %cst_53 : f32 to vector<64x2xf32>
    %86 = arith.select %84, %9, %85 : vector<64x2xi1>, vector<64x2xf32>
    %cst_54 = arith.constant dense<0.000000e+00> : vector<2xf32>
    %87 = vector.multi_reduction <add>, %86, %cst_54 [0] : vector<64x2xf32> to vector<2xf32>
    %88 = vector.shape_cast %87 : vector<2xf32> to vector<1x2xf32>
    %c9_55 = arith.constant 9 : index
    %c0_56 = arith.constant 0 : index
    %89 = vector.load %arg5[%c9_55, %c0_56] : memref<12x2xf32, #tpu.memory_space<vmem>>, vector<1x2xf32>
    tpu.vector_store %arg5[%c9_55, %c0_56], %88 {strides = array<i32>} : memref<12x2xf32, #tpu.memory_space<vmem>>, vector<1x2xf32>,
    %c10 = arith.constant 10 : index
    %c0_57 = arith.constant 0 : index
    %90 = vector.load %arg4[%c10, %c0_57] : memref<12x2xi32, #tpu.memory_space<vmem>>, vector<1x2xi32>
    %91 = vector.broadcast %90 : vector<1x2xi32> to vector<64x2xi32>
    %92 = arith.cmpi eq, %91, %0 : vector<64x2xi32>
    %cst_58 = arith.constant 0.000000e+00 : f32
    %93 = vector.broadcast %cst_58 : f32 to vector<64x2xf32>
    %94 = arith.select %92, %9, %93 : vector<64x2xi1>, vector<64x2xf32>
    %cst_59 = arith.constant dense<0.000000e+00> : vector<2xf32>
    %95 = vector.multi_reduction <add>, %94, %cst_59 [0] : vector<64x2xf32> to vector<2xf32>
    %96 = vector.shape_cast %95 : vector<2xf32> to vector<1x2xf32>
    %c10_60 = arith.constant 10 : index
    %c0_61 = arith.constant 0 : index
    %97 = vector.load %arg5[%c10_60, %c0_61] : memref<12x2xf32, #tpu.memory_space<vmem>>, vector<1x2xf32>
    tpu.vector_store %arg5[%c10_60, %c0_61], %96 {strides = array<i32>} : memref<12x2xf32, #tpu.memory_space<vmem>>, vector<1x2xf32>,
    %c11 = arith.constant 11 : index
    %c0_62 = arith.constant 0 : index
    %98 = vector.load %arg4[%c11, %c0_62] : memref<12x2xi32, #tpu.memory_space<vmem>>, vector<1x2xi32>
    %99 = vector.broadcast %98 : vector<1x2xi32> to vector<64x2xi32>
    %100 = arith.cmpi eq, %99, %0 : vector<64x2xi32>
    %cst_63 = arith.constant 0.000000e+00 : f32
    %101 = vector.broadcast %cst_63 : f32 to vector<64x2xf32>
    %102 = arith.select %100, %9, %101 : vector<64x2xi1>, vector<64x2xf32>
    %cst_64 = arith.constant dense<0.000000e+00> : vector<2xf32>
    %103 = vector.multi_reduction <add>, %102, %cst_64 [0] : vector<64x2xf32> to vector<2xf32>
    %104 = vector.shape_cast %103 : vector<2xf32> to vector<1x2xf32>
    %c11_65 = arith.constant 11 : index
    %c0_66 = arith.constant 0 : index
    %105 = vector.load %arg5[%c11_65, %c0_66] : memref<12x2xf32, #tpu.memory_space<vmem>>, vector<1x2xf32>
    tpu.vector_store %arg5[%c11_65, %c0_66], %104 {strides = array<i32>} : memref<12x2xf32, #tpu.memory_space<vmem>>, vector<1x2xf32>,
    return
  }
  func.func @transform_0(%arg0: i32) -> (i32, i32) {
    %c0_i32 = arith.constant 0 : i32
    %c0_i32_0 = arith.constant 0 : i32
    %c0_i32_1 = arith.constant 0 : i32
    return %c0_i32, %c0_i32_0 : i32, i32
  }
  func.func @transform_1(%arg0: i32) -> (i32, i32) {
    %c0_i32 = arith.constant 0 : i32
    %c0_i32_0 = arith.constant 0 : i32
    %c0_i32_1 = arith.constant 0 : i32
    return %c0_i32, %c0_i32_0 : i32, i32
  }
  func.func @transform_2(%arg0: i32) -> (i32, i32) {
    %c0_i32 = arith.constant 0 : i32
    %c0_i32_0 = arith.constant 0 : i32
    return %c0_i32, %arg0 : i32, i32
  }
  func.func @transform_3(%arg0: i32) -> (i32, i32) {
    %c0_i32 = arith.constant 0 : i32
    %c0_i32_0 = arith.constant 0 : i32
    return %c0_i32, %arg0 : i32, i32
  }
  func.func @transform_4(%arg0: i32) -> (i32, i32) {
    %c0_i32 = arith.constant 0 : i32
    %c0_i32_0 = arith.constant 0 : i32
    return %c0_i32, %arg0 : i32, i32
  }
}

</mosaic_0001>

<bundles_post_ra>
// kernel: tpu_custom_call.1
= control target key start
LH: loop header
LB: loop body
LE: loop exit
PB: predicated region body
PF: predicated region fallthrough
CT: control target
= control target key end

     0   :  { %v17_v0 = vlaneseq  ;;  %vm59_vm0 = vcmask 523264   ;;  %v949_v9 = vmov 1.0|1.0   ;;  %vm165_vm13 = vcmask 261120   ;;  %s1965_s2 = inlined_call_operand.vmem [shape: s32[1,2], index: 2, kind: input, shape index: {}]   ;;  %s1966_s0 = inlined_call_operand.vmem [shape: f32[32,64], index: 0, kind: input, shape index: {}]   ;;  %s1967_s1 = inlined_call_operand.vmem [shape: f32[64,32], index: 1, kind: input, shape index: {}]   ;;  %s1968_s3 = inlined_call_operand.vmem [shape: s32[12,2], index: 3, kind: input, shape index: {}]   ;;  %s1969_s4 = inlined_call_operand.vmem [shape: f32[12,2], index: 4, kind: output, shape index: {}]  }
   0x1   :  { %v817_v1 = vld [vmem:[%s1965_s2] ss:$0 sm:$0xff]  ;;  %v56_v12 = vld [vmem:[%s1966_s0 + $0x8] sm:$0xff]  ;;  %v57_v13 = vld [vmem:[%s1966_s0 + $0x10] sm:$0xff]  ;;  %vm316_vm15 = vcmask 15360  }
   0x2   :  { %v55_v2 = vld [vmem:[%s1966_s0] sm:$0xff]  ;;  %v981_v3 = vshrl.u32 %v17_v0, 7  ;;  %v58_v14 = vld [vmem:[%s1966_s0 + $0x18] sm:$0xff]  ;;  %v158_v22 = vld [vmem:[%s1967_s1 + $0x8] sm:$0xff] }
   0x3   :  { %898 = vmatprep.mubr.msk.f32.mxu0 %vm59_vm0, %v55_v2  ;;  %v157_v15 = vld [vmem:[%s1967_s1] sm:$0xff]  ;;  %v159_v23 = vld [vmem:[%s1967_s1 + $0x10] sm:$0xff]  ;;  %v160_v24 = vld [vmem:[%s1967_s1 + $0x18] sm:$0xff] }
   0x4   :  { %v985_v4 = vadd.s32 8, %v981_v3  ;;  %vm31_vm1 = vcmp.eq.s32.totalorder %v817_v1, %v981_v3  ;;  %v989_v5 = vadd.s32 16, %v981_v3  ;;  %v992_v6 = vadd.s32 24, %v981_v3  ;;  %912 = vmatprep.mubr.msk.f32.mxu1 %vm165_vm13, %v157_v15  ;;  %v161_v25 = vld [vmem:[%s1967_s1 + $0x20] sm:$0xff]  ;;  %v162_v26 = vld [vmem:[%s1967_s1 + $0x28] sm:$0xff]  ;;  %v163_v27 = vld [vmem:[%s1967_s1 + $0x30] sm:$0xff] }
   0x5   :  { %v995_v7 = vadd.s32 32, %v981_v3  ;;  %v998_v8 = vadd.s32 40, %v981_v3  ;;  %v1006_v10 = vadd.s32 48, %v981_v3  ;;  %v1009_v11 = vadd.s32 56, %v981_v3  ;;  %v164_v28 = vld [vmem:[%s1967_s1 + $0x38] sm:$0xff] }
   0x6   :  { %vm32_vm2 = vcmp.eq.s32.totalorder %v817_v1, %v985_v4  ;;  %vm33_vm3 = vcmp.eq.s32.totalorder %v817_v1, %v989_v5  ;;  %vm34_vm4 = vcmp.eq.s32.totalorder %v817_v1, %v992_v6  ;;  %v1060_v29 = vld [vmem:[%s1968_s3] ss:$0 sm:$0xff]  ;;  %v1065_v30 = vld [vmem:[%s1968_s3 + $0x1] ss:$0 sm:$0xff]  ;;  %v1070_v31 = vld [vmem:[%s1968_s3 + $0x2] ss:$0 sm:$0xff] }
   0x7   :  { %vm924_vm5 = vmpackc.low %vm32_vm2, %vm31_vm1  ;;  %vm35_vm7 = vcmp.eq.s32.totalorder %v817_v1, %v995_v7  ;;  %vm36_vm8 = vcmp.eq.s32.totalorder %v817_v1, %v998_v8  ;;  %vm37_vm10 = vcmp.eq.s32.totalorder %v817_v1, %v1006_v10  ;;  %vm38_vm11 = vcmp.eq.s32.totalorder %v817_v1, %v1009_v11  ;;  %v1075_v32 = vld [vmem:[%s1968_s3 + $0x3] ss:$0 sm:$0xff]  ;;  %v1080_v33 = vld [vmem:[%s1968_s3 + $0x4] ss:$0 sm:$0xff] }
   0x8   :  { %925 = vmatprep.subr.msk.bf16.mxu0 %vm924_vm5, %v949_v9  ;;  %vm928_vm6 = vmpackc.low %vm34_vm4, %vm33_vm3  ;;  %v1085_v34 = vld [vmem:[%s1968_s3 + $0x5] ss:$0 sm:$0xff]  ;;  %v1090_v35 = vld [vmem:[%s1968_s3 + $0x6] ss:$0 sm:$0xff]  ;;  %vm301_vm14 = vcmp.eq.s32.totalorder %v1060_v29, %v985_v4  ;;  %vm389_vm1 = vcmp.eq.s32.totalorder %v1070_v31, %v985_v4  ;;  %vm432_vm2 = vcmp.eq.s32.totalorder %v1075_v32, %v985_v4  ;;  %vm475_vm3 = vcmp.eq.s32.totalorder %v1080_v33, %v985_v4 }
   0x9   :  { %927 = vmatpush3.bf16.msk.msra.mxu0 %vm924_vm5, %v949_v9  ;;  %vm932_vm9 = vmpackc.low %vm36_vm8, %vm35_vm7  ;;  %v1095_v36 = vld [vmem:[%s1968_s3 + $0x7] ss:$0 sm:$0xff]  ;;  %v1100_v37 = vld [vmem:[%s1968_s3 + $0x8] ss:$0 sm:$0xff]  ;;  %vm518_vm4 = vcmp.eq.s32.totalorder %v1085_v34, %v985_v4  ;;  %vm561_vm5 = vcmp.eq.s32.totalorder %v1090_v35, %v985_v4  ;;  %vm431_vm7 = vcmp.eq.s32.totalorder %v1075_v32, %v981_v3  ;;  %vm474_vm8 = vcmp.eq.s32.totalorder %v1080_v33, %v981_v3 }
   0xa   :  { %929 = vmatprep.subr.msk.bf16.mxu0 %vm928_vm6, %v949_v9  ;;  %vm936_vm12 = vmpackc.low %vm38_vm11, %vm37_vm10  ;;  %v1107_v38 = vld [vmem:[%s1968_s3 + $0x9] ss:$0 sm:$0xff]  ;;  %v1112_v39 = vld [vmem:[%s1968_s3 + $0xa] ss:$0 sm:$0xff]  ;;  %vm560_vm10 = vcmp.eq.s32.totalorder %v1090_v35, %v981_v3  ;;  %vm603_vm11 = vcmp.eq.s32.totalorder %v1095_v36, %v981_v3 }
   0xb   :  { %v1117_v40 = vld [vmem:[%s1968_s3 + $0xb] ss:$0 sm:$0xff] }
   0xd   :  { %931 = vmatpush3.bf16.msk.msra.mxu0 %vm928_vm6, %v949_v9  ;;  %vm604_vm6 = vcmp.eq.s32.totalorder %v1095_v36, %v985_v4 }
   0xe   :  { %933 = vmatprep.subr.msk.bf16.mxu0 %vm932_vm9, %v949_v9 }
  0x11   :  { %935 = vmatpush3.bf16.msk.msra.mxu0 %vm932_vm9, %v949_v9  ;;  %vm517_vm9 = vcmp.eq.s32.totalorder %v1085_v34, %v981_v3 }
  0x12   :  { %937 = vmatprep.subr.msk.bf16.mxu0 %vm936_vm12, %v949_v9 }
  0x15   :  { %939 = vmatpush3.bf16.msk.msra.mxu0 %vm936_vm12, %v949_v9  ;;  %vm345_vm12 = vcmp.eq.s32.totalorder %v1065_v30, %v981_v3 }
  0x18   :  { %899 = vmatmul.mubr.msk.f32.vlgmr.msra.gmra.mrb[0].mxu0 %vm59_vm0, %v56_v12 }
  0x19   :  { %901 = vmatprep.mubr.msk.f32.mxu0 %vm59_vm0, %v57_v13 }
  0x1c   :  { %902 = vmatmul.mubr.msk.f32.gmra.mrb[2].mxu0 %vm59_vm0, %v58_v14  ;;  %vm346_vm0 = vcmp.eq.s32.totalorder %v1065_v30, %v985_v4 }
  0xeb   :  { %v900_v16 = vpop.f32.mrb[0].mxu0 }
  0xec   :  { %v138_v17 = vpop.f32.mrb[1].mxu0 }
  0xed   :  { %v940_v18 = vpack.c.bf16 %v900_v16, %v138_v17 }
  0xef   :  { %v903_v19 = vpop.f32.mrb[2].mxu0  ;;  %941 = vmatprep.subr.bf16.mxu1 %v940_v18 }
  0xf0   :  { %v148_v20 = vpop.f32.mrb[3].mxu0  ;;  %943 = vmatpush3.bf16.msra.mxu1 %v940_v18 }
  0xf1   :  { %v944_v21 = vpack.c.bf16 %v903_v19, %v148_v20 }
  0xf3   :  { %945 = vmatprep.subr.bf16.mxu1 %v944_v21 }
  0xf4   :  { %947 = vmatpush3.bf16.msra.mxu1 %v944_v21 }
  0xf7   :  { %913 = vmatmul.mubr.msk.f32.vlgmr.msra.gmra.mrb[0].mxu1 %vm165_vm13, %v158_v22 }
  0xf8   :  { %915 = vmatprep.mubr.msk.f32.mxu1 %vm165_vm13, %v159_v23 }
  0xfb   :  { %916 = vmatmul.mubr.msk.f32.gmra.mrb[2].mxu1 %vm165_vm13, %v160_v24 }
  0xfc   :  { %918 = vmatprep.mubr.msk.f32.mxu1 %vm165_vm13, %v161_v25 }
  0xff   :  { %919 = vmatmul.mubr.msk.f32.gmra.mrb[4].mxu1 %vm165_vm13, %v162_v26 }
 0x100   :  { %921 = vmatprep.mubr.msk.f32.mxu1 %vm165_vm13, %v163_v27 }
 0x103   :  { %922 = vmatmul.mubr.msk.f32.gmra.mrb[6].mxu1 %vm165_vm13, %v164_v28  ;;  %vm388_vm13 = vcmp.eq.s32.totalorder %v1070_v31, %v981_v3 }
 0x1ca   :  { %v914_v41 = vpop.f32.mrb[0].mxu1 }
 0x1cb   :  { %v309_v42 = vsel %vm301_vm14, %v914_v41, 0.0  ;;  %v354_v43 = vsel %vm346_vm0, %v914_v41, 0.0  ;;  %v397_v44 = vsel %vm389_vm1, %v914_v41, 0.0  ;;  %v440_v45 = vsel %vm432_vm2, %v914_v41, 0.0  ;;  %v1169_v46 = vpop.f32.mrb[1].mxu1 }
 0x1cc   :  { %v318_v47 = vsel %vm316_vm15, %v309_v42, 0.0  ;;  %v362_v48 = vsel %vm316_vm15, %v354_v43, 0.0  ;;  %v405_v49 = vsel %vm316_vm15, %v397_v44, 0.0  ;;  %v448_v50 = vsel %vm316_vm15, %v440_v45, 0.0 }
 0x1cd   :  { %vm646_vm14 = vcmp.eq.s32.totalorder %v1100_v37, %v981_v3  ;;  %vm689_vm0 = vcmp.eq.s32.totalorder %v1107_v38, %v981_v3  ;;  %v483_v51 = vsel %vm475_vm3, %v914_v41, 0.0  ;;  %v526_v52 = vsel %vm518_vm4, %v914_v41, 0.0 }
 0x1ce   :  { %v569_v53 = vsel %vm561_vm5, %v914_v41, 0.0  ;;  %v612_v54 = vsel %vm604_vm6, %v914_v41, 0.0  ;;  %v491_v55 = vsel %vm316_vm15, %v483_v51, 0.0  ;;  %v534_v56 = vsel %vm316_vm15, %v526_v52, 0.0  ;;  %v1199_v59 = vpop.f32.mrb[2].mxu1 }
 0x1cf   :  { %v577_v57 = vsel %vm316_vm15, %v569_v53, 0.0  ;;  %v620_v58 = vsel %vm316_vm15, %v612_v54, 0.0  ;;  %vm1970_vm3 = vcmp.eq.s32.totalorder %v1100_v37, %v985_v4  ;;  %vm1971_vm4 = vcmp.eq.s32.totalorder %v1107_v38, %v985_v4  ;;  %v1221_v0 = vpop.f32.mrb[3].mxu1 }
 0x1d0   :  { %v655_v60 = vsel %vm1970_vm3, %v914_v41, 0.0  ;;  %v698_v61 = vsel %vm1971_vm4, %v914_v41, 0.0  ;;  %vm1972_vm5 = vcmp.eq.s32.totalorder %v1112_v39, %v985_v4  ;;  %vm1973_vm6 = vcmp.eq.s32.totalorder %v1117_v40, %v985_v4 }
 0x1d1   :  { %v741_v62 = vsel %vm1972_vm5, %v914_v41, 0.0  ;;  %v784_v63 = vsel %vm1973_vm6, %v914_v41, 0.0  ;;  %vm303_vm2 = vcmp.eq.s32.totalorder %v1060_v29, %v992_v6  ;;  %vm348_vm1 = vcmp.eq.s32.totalorder %v1065_v30, %v992_v6 }
 0x1d2   :  { %vm391_vm3 = vcmp.eq.s32.totalorder %v1070_v31, %v992_v6  ;;  %v663_v1 = vsel %vm316_vm15, %v655_v60, 0.0  ;;  %v706_v2 = vsel %vm316_vm15, %v698_v61, 0.0  ;;  %v749_v4 = vsel %vm316_vm15, %v741_v62, 0.0  ;;  %v1255_v20 = vpop.f32.mrb[4].mxu1 }
 0x1d3   :  { %v792_v9 = vsel %vm316_vm15, %v784_v63, 0.0  ;;  %vm1974_vm5 = vcmp.eq.s32.totalorder %v1060_v29, %v981_v3  ;;  %v353_v13 = vsel %vm345_vm12, %v1169_v46, 0.0  ;;  %v396_v14 = vsel %vm388_vm13, %v1169_v46, 0.0  ;;  %v1271_v25 = vpop.f32.mrb[5].mxu1 }
 0x1d4   :  { %v308_v12 = vsel %vm1974_vm5, %v1169_v46, 0.0  ;;  %v439_v15 = vsel %vm431_vm7, %v1169_v46, 0.0  ;;  %vm477_vm6 = vcmp.eq.s32.totalorder %v1080_v33, %v992_v6  ;;  %vm520_vm5 = vcmp.eq.s32.totalorder %v1085_v34, %v992_v6 }
 0x1d5   :  { %vm563_vm4 = vcmp.eq.s32.totalorder %v1090_v35, %v992_v6  ;;  %v317_v16 = vsel %vm316_vm15, %v308_v12, 0.0  ;;  %v361_v17 = vsel %vm316_vm15, %v353_v13, 0.0  ;;  %v404_v18 = vsel %vm316_vm15, %v396_v14, 0.0 }
 0x1d6   :  { %v447_v19 = vsel %vm316_vm15, %v439_v15, 0.0  ;;  %v1257_v21 = vadd.f32 %v318_v47, %v317_v16  ;;  %v1259_v22 = vadd.f32 %v362_v48, %v361_v17  ;;  %v1261_v23 = vadd.f32 %v405_v49, %v404_v18  ;;  %v1311_v51 = vpop.f32.mrb[6].mxu1 }
 0x1d7   :  { %v1263_v24 = vadd.f32 %v448_v50, %v447_v19  ;;  %vm649_vm7 = vcmp.eq.s32.totalorder %v1100_v37, %v992_v6  ;;  %vm692_vm13 = vcmp.eq.s32.totalorder %v1107_v38, %v992_v6  ;;  %v482_v26 = vsel %vm474_vm8, %v1169_v46, 0.0 }
 0x1d8   :  { %v525_v27 = vsel %vm517_vm9, %v1169_v46, 0.0  ;;  %v568_v28 = vsel %vm560_vm10, %v1169_v46, 0.0  ;;  %v611_v41 = vsel %vm603_vm11, %v1169_v46, 0.0  ;;  %vm778_vm12 = vcmp.eq.s32.totalorder %v1117_v40, %v992_v6 }
 0x1d9   :  { %v490_v42 = vsel %vm316_vm15, %v482_v26, 0.0  ;;  %v533_v43 = vsel %vm316_vm15, %v525_v27, 0.0  ;;  %v576_v44 = vsel %vm316_vm15, %v568_v28, 0.0  ;;  %v619_v45 = vsel %vm316_vm15, %v611_v41, 0.0 }
 0x1da   :  { %vm302_vm8 = vcmp.eq.s32.totalorder %v1060_v29, %v989_v5  ;;  %vm347_vm9 = vcmp.eq.s32.totalorder %v1065_v30, %v989_v5  ;;  %v1303_v47 = vadd.f32 %v491_v55, %v490_v42  ;;  %v1305_v48 = vadd.f32 %v534_v56, %v533_v43  ;;  %v1329_v56 = vpop.f32.mrb[7].mxu1 }
 0x1db   :  { %v1307_v49 = vadd.f32 %v577_v57, %v576_v44  ;;  %v1309_v50 = vadd.f32 %v620_v58, %v619_v45  ;;  %v654_v52 = vsel %vm646_vm14, %v1169_v46, 0.0  ;;  %v697_v53 = vsel %vm689_vm0, %v1169_v46, 0.0 }
 0x1dc   :  { %vm1975_vm11 = vcmp.eq.s32.totalorder %v1112_v39, %v981_v3  ;;  %vm1976_vm10 = vcmp.eq.s32.totalorder %v1117_v40, %v981_v3  ;;  %v662_v57 = vsel %vm316_vm15, %v654_v52, 0.0  ;;  %v705_v58 = vsel %vm316_vm15, %v697_v53, 0.0 }
 0x1dd   :  { %v740_v54 = vsel %vm1975_vm11, %v1169_v46, 0.0  ;;  %v783_v55 = vsel %vm1976_vm10, %v1169_v46, 0.0  ;;  %vm476_vm14 = vcmp.eq.s32.totalorder %v1080_v33, %v989_v5  ;;  %vm519_vm0 = vcmp.eq.s32.totalorder %v1085_v34, %v989_v5 }
 0x1de   :  { %v748_v60 = vsel %vm316_vm15, %v740_v54, 0.0  ;;  %v791_v61 = vsel %vm316_vm15, %v783_v55, 0.0  ;;  %vm562_vm11 = vcmp.eq.s32.totalorder %v1090_v35, %v989_v5  ;;  %v1343_v3 = vadd.f32 %v663_v1, %v662_v57 }
 0x1df   :  { %v1345_v46 = vadd.f32 %v706_v2, %v705_v58  ;;  %v1347_v62 = vadd.f32 %v749_v4, %v748_v60  ;;  %v1349_v63 = vadd.f32 %v792_v9, %v791_v61  ;;  %v311_v12 = vsel %vm303_vm2, %v1199_v59, 0.0 }
 0x1e0   :  { %v356_v13 = vsel %vm348_vm1, %v1199_v59, 0.0  ;;  %v399_v1 = vsel %vm391_vm3, %v1199_v59, 0.0  ;;  %vm1977_vm10 = vcmp.eq.s32.totalorder %v1075_v32, %v992_v6  ;;  %v1368_v4 = vsel %vm316_vm15, %v311_v12, 0.0 }
 0x1e1   :  { %v442_v2 = vsel %vm1977_vm10, %v1199_v59, 0.0  ;;  %v1371_v9 = vsel %vm316_vm15, %v356_v13, 0.0  ;;  %v1374_v14 = vsel %vm316_vm15, %v399_v1, 0.0  ;;  %vm648_vm1 = vcmp.eq.s32.totalorder %v1100_v37, %v989_v5 }
 0x1e2   :  { %vm691_vm2 = vcmp.eq.s32.totalorder %v1107_v38, %v989_v5  ;;  %vm777_vm10 = vcmp.eq.s32.totalorder %v1117_v40, %v989_v5  ;;  %v485_v15 = vsel %vm477_vm6, %v1199_v59, 0.0  ;;  %v528_v16 = vsel %vm520_vm5, %v1199_v59, 0.0 }
 0x1e3   :  { %v571_v17 = vsel %vm563_vm4, %v1199_v59, 0.0  ;;  %vm1978_vm3 = vcmp.eq.s32.totalorder %v1095_v36, %v992_v6  ;;  %v1401_v19 = vsel %vm316_vm15, %v442_v2, 0.0  ;;  %v1404_v26 = vsel %vm316_vm15, %v485_v15, 0.0 }
 0x1e4   :  { %v614_v18 = vsel %vm1978_vm3, %v1199_v59, 0.0  ;;  %v1407_v27 = vsel %vm316_vm15, %v528_v16, 0.0  ;;  %v1410_v28 = vsel %vm316_vm15, %v571_v17, 0.0  ;;  %v657_v42 = vsel %vm649_vm7, %v1199_v59, 0.0 }
 0x1e5   :  { %v1413_v41 = vsel %vm316_vm15, %v614_v18, 0.0  ;;  %v700_v43 = vsel %vm692_vm13, %v1199_v59, 0.0  ;;  %vm1979_vm4 = vcmp.eq.s32.totalorder %v1112_v39, %v992_v6  ;;  %vm304_vm6 = vcmp.eq.s32.totalorder %v1060_v29, %v995_v7 }
 0x1e6   :  { %v743_v44 = vsel %vm1979_vm4, %v1199_v59, 0.0  ;;  %vm349_vm5 = vcmp.eq.s32.totalorder %v1065_v30, %v995_v7  ;;  %v1434_v45 = vsel %vm316_vm15, %v657_v42, 0.0  ;;  %v1437_v52 = vsel %vm316_vm15, %v700_v43, 0.0 }
 0x1e7   :  { %v1440_v53 = vsel %vm316_vm15, %v743_v44, 0.0  ;;  %v786_v54 = vsel %vm778_vm12, %v1199_v59, 0.0  ;;  %vm435_vm7 = vcmp.eq.s32.totalorder %v1075_v32, %v995_v7  ;;  %v310_v55 = vsel %vm302_vm8, %v1221_v0, 0.0 }
 0x1e8   :  { %v355_v6 = vsel %vm347_vm9, %v1221_v0, 0.0  ;;  %vm1980_vm12 = vcmp.eq.s32.totalorder %v1070_v31, %v989_v5  ;;  %vm1981_vm4 = vcmp.eq.s32.totalorder %v1075_v32, %v989_v5  ;;  %vm607_vm3 = vcmp.eq.s32.totalorder %v1095_v36, %v995_v7 }
 0x1e9   :  { %v398_v59 = vsel %vm1980_vm12, %v1221_v0, 0.0  ;;  %v441_v57 = vsel %vm1981_vm4, %v1221_v0, 0.0  ;;  %vm650_vm8 = vcmp.eq.s32.totalorder %v1100_v37, %v995_v7  ;;  %vm736_vm9 = vcmp.eq.s32.totalorder %v1112_v39, %v995_v7 }
 0x1ea   :  { %v320_v58 = vsel %vm316_vm15, %v310_v55, 0.0  ;;  %v364_v60 = vsel %vm316_vm15, %v355_v6, 0.0  ;;  %v407_v61 = vsel %vm316_vm15, %v398_v59, 0.0  ;;  %v450_v12 = vsel %vm316_vm15, %v441_v57, 0.0 }
 0x1eb   :  { %vm306_vm12 = vcmp.eq.s32.totalorder %v1060_v29, %v1006_v10  ;;  %v321_v13 = vadd.f32 %v320_v58, %v1257_v21  ;;  %v1490_v1 = vadd.f32 %v364_v60, %v1259_v22  ;;  %v1493_v2 = vadd.f32 %v407_v61, %v1261_v23 }
 0x1ec   :  { %v1496_v15 = vadd.f32 %v450_v12, %v1263_v24  ;;  %v484_v16 = vsel %vm476_vm14, %v1221_v0, 0.0  ;;  %v527_v21 = vsel %vm519_vm0, %v1221_v0, 0.0  ;;  %v570_v22 = vsel %vm562_vm11, %v1221_v0, 0.0 }
 0x1ed   :  { %vm1982_vm13 = vcmp.eq.s32.totalorder %v1095_v36, %v989_v5  ;;  %vm350_vm4 = vcmp.eq.s32.totalorder %v1065_v30, %v998_v8  ;;  %vm351_vm14 = vcmp.eq.s32.totalorder %v1065_v30, %v1006_v10  ;;  %v493_v24 = vsel %vm316_vm15, %v484_v16, 0.0 }
 0x1ee   :  { %v613_v23 = vsel %vm1982_vm13, %v1221_v0, 0.0  ;;  %v536_v17 = vsel %vm316_vm15, %v527_v21, 0.0  ;;  %v579_v18 = vsel %vm316_vm15, %v570_v22, 0.0  ;;  %v1527_v43 = vadd.f32 %v493_v24, %v1303_v47 }
 0x1ef   :  { %v622_v42 = vsel %vm316_vm15, %v613_v23, 0.0  ;;  %v1530_v44 = vadd.f32 %v536_v17, %v1305_v48  ;;  %v1533_v55 = vadd.f32 %v579_v18, %v1307_v49  ;;  %vm393_vm11 = vcmp.eq.s32.totalorder %v1070_v31, %v998_v8 }
 0x1f0   :  { %v1536_v6 = vadd.f32 %v622_v42, %v1309_v50  ;;  %v656_v47 = vsel %vm648_vm1, %v1221_v0, 0.0  ;;  %v699_v48 = vsel %vm691_vm2, %v1221_v0, 0.0  ;;  %vm1983_vm0 = vcmp.eq.s32.totalorder %v1112_v39, %v989_v5 }
 0x1f1   :  { %v742_v49 = vsel %vm1983_vm0, %v1221_v0, 0.0  ;;  %v785_v50 = vsel %vm777_vm10, %v1221_v0, 0.0  ;;  %vm395_vm13 = vcmp.eq.s32.totalorder %v1070_v31, %v1009_v11  ;;  %v665_v59 = vsel %vm316_vm15, %v656_v47, 0.0 }
 0x1f2   :  { %v708_v57 = vsel %vm316_vm15, %v699_v48, 0.0  ;;  %v751_v58 = vsel %vm316_vm15, %v742_v49, 0.0  ;;  %v794_v60 = vsel %vm316_vm15, %v785_v50, 0.0  ;;  %v1565_v61 = vadd.f32 %v665_v59, %v1343_v3 }
 0x1f3   :  { %v1568_v12 = vadd.f32 %v708_v57, %v1345_v46  ;;  %v1571_v5 = vadd.f32 %v751_v58, %v1347_v62  ;;  %v1574_v0 = vadd.f32 %v794_v60, %v1349_v63  ;;  %vm436_vm1 = vcmp.eq.s32.totalorder %v1075_v32, %v998_v8 }
 0x1f4   :  { %vm437_vm2 = vcmp.eq.s32.totalorder %v1075_v32, %v1006_v10  ;;  %v1581_v16 = vsel %vm316_vm15, %v786_v54, 0.0  ;;  %v312_v3 = vsel %vm304_vm6, %v1271_v25, 0.0  ;;  %v357_v46 = vsel %vm349_vm5, %v1271_v25, 0.0 }
 0x1f5   :  { %vm1984_vm10 = vcmp.eq.s32.totalorder %v1070_v31, %v995_v7  ;;  %v443_v63 = vsel %vm435_vm7, %v1271_v25, 0.0  ;;  %vm1985_vm0 = vcmp.eq.s32.totalorder %v1080_v33, %v995_v7  ;;  %vm1986_vm6 = vcmp.eq.s32.totalorder %v1085_v34, %v995_v7 }
 0x1f6   :  { %v400_v62 = vsel %vm1984_vm10, %v1271_v25, 0.0  ;;  %v1603_v54 = vsel %vm1985_vm0, %v1271_v25, 0.0  ;;  %v1609_v21 = vsel %vm1986_vm6, %v1271_v25, 0.0  ;;  %vm1987_vm5 = vcmp.eq.s32.totalorder %v1090_v35, %v995_v7 }
 0x1f7   :  { %v1615_v22 = vsel %vm1987_vm5, %v1271_v25, 0.0  ;;  %vm438_vm7 = vcmp.eq.s32.totalorder %v1075_v32, %v1009_v11  ;;  %v1623_v23 = vsel %vm607_vm3, %v1271_v25, 0.0  ;;  %v1629_v24 = vsel %vm650_vm8, %v1271_v25, 0.0 }
 0x1f8   :  { %vm1988_vm10 = vcmp.eq.s32.totalorder %v1107_v38, %v995_v7  ;;  %v1641_v18 = vsel %vm736_vm9, %v1271_v25, 0.0  ;;  %vm479_vm3 = vcmp.eq.s32.totalorder %v1080_v33, %v998_v8  ;;  %vm1989_vm8 = vcmp.eq.s32.totalorder %v1060_v29, %v998_v8 }
 0x1f9   :  { %v1635_v17 = vsel %vm1988_vm10, %v1271_v25, 0.0  ;;  %v313_v42 = vsel %vm1989_vm8, %v1255_v20, 0.0  ;;  %v314_v47 = vsel %vm306_vm12, %v1329_v56, 0.0  ;;  %vm1990_vm0 = vcmp.eq.s32.totalorder %v1060_v29, %v1009_v11 }
 0x1fa   :  { %v315_v48 = vsel %vm1990_vm0, %v1311_v51, 0.0  ;;  %v323_v49 = vadd.f32 %v1368_v4, %v321_v13  ;;  %vm480_vm9 = vcmp.eq.s32.totalorder %v1080_v33, %v1006_v10  ;;  %vm481_vm6 = vcmp.eq.s32.totalorder %v1080_v33, %v1009_v11 }
 0x1fb   :  { %vm1991_vm5 = vcmp.eq.s32.totalorder %v1117_v40, %v995_v7  ;;  %v324_v59 = vsel %vm316_vm15, %v312_v3, 0.0  ;;  %v326_v57 = vsel %vm316_vm15, %v313_v42, 0.0  ;;  %v328_v29 = vsel %vm316_vm15, %v314_v47, 0.0 }
 0x1fc   :  { %v1666_v50 = vsel %vm1991_vm5, %v1271_v25, 0.0  ;;  %v325_v58 = vadd.f32 %v324_v59, %v323_v49  ;;  %v330_v4 = vsel %vm316_vm15, %v315_v48, 0.0  ;;  %v358_v13 = vsel %vm350_vm4, %v1255_v20, 0.0 }
 0x1fd   :  { %v359_v7 = vsel %vm351_vm14, %v1329_v56, 0.0  ;;  %vm1992_vm12 = vcmp.eq.s32.totalorder %v1065_v30, %v1009_v11  ;;  %v367_v60 = vadd.f32 %v1371_v9, %v1490_v1  ;;  %v368_v3 = vsel %vm316_vm15, %v357_v46, 0.0 }
 0x1fe   :  { %v360_v25 = vsel %vm1992_vm12, %v1311_v51, 0.0  ;;  %v370_v42 = vsel %vm316_vm15, %v358_v13, 0.0  ;;  %v327_v47 = vadd.f32 %v326_v57, %v325_v58  ;;  %v372_v48 = vsel %vm316_vm15, %v359_v7, 0.0 }
 0x1ff   :  { %v401_v49 = vsel %vm393_vm11, %v1255_v20, 0.0  ;;  %vm1993_vm4 = vcmp.eq.s32.totalorder %v1070_v31, %v1006_v10  ;;  %vm522_vm14 = vcmp.eq.s32.totalorder %v1085_v34, %v998_v8  ;;  %v369_v9 = vadd.f32 %v368_v3, %v367_v60 }
 0x200   :  { %v402_v30 = vsel %vm1993_vm4, %v1329_v56, 0.0  ;;  %v403_v1 = vsel %vm395_vm13, %v1311_v51, 0.0  ;;  %v410_v46 = vadd.f32 %v1374_v14, %v1493_v2  ;;  %v411_v59 = vsel %vm316_vm15, %v400_v62, 0.0 }
 0x201   :  { %vm523_vm11 = vcmp.eq.s32.totalorder %v1085_v34, %v1006_v10  ;;  %v329_v57 = vadd.f32 %v328_v29, %v327_v47  ;;  %v374_v58 = vsel %vm316_vm15, %v360_v25, 0.0  ;;  %v413_v13 = vsel %vm316_vm15, %v401_v49, 0.0 }
 0x202   :  { %v415_v7 = vsel %vm316_vm15, %v402_v30, 0.0  ;;  %v371_v60 = vadd.f32 %v370_v42, %v369_v9  ;;  %v412_v3 = vadd.f32 %v411_v59, %v410_v46  ;;  %v444_v31 = vsel %vm436_vm1, %v1255_v20, 0.0 }
 0x203   :  { %v445_v14 = vsel %vm437_vm2, %v1329_v56, 0.0  ;;  %vm524_vm13 = vcmp.eq.s32.totalorder %v1085_v34, %v1009_v11  ;;  %v331_v2 = vadd.f32 %v330_v4, %v329_v57  ;;  %v417_v62 = vsel %vm316_vm15, %v403_v1, 0.0 }
 0x204   :  { %v453_v29 = vadd.f32 %v1401_v19, %v1496_v15  ;;  %v454_v25 = vsel %vm316_vm15, %v443_v63, 0.0  ;;  %v373_v42 = vadd.f32 %v372_v48, %v371_v60  ;;  %v414_v47 = vadd.f32 %v413_v13, %v412_v3 }
 0x205   :  { %v446_v49 = vsel %vm438_vm7, %v1311_v51, 0.0  ;;  %v456_v30 = vsel %vm316_vm15, %v444_v31, 0.0  ;;  %v332_v9 = vrot.slane %v331_v2, 4  ;;  %v458_v4 = vsel %vm316_vm15, %v445_v14, 0.0 }
 0x206   :  { %v455_v46 = vadd.f32 %v454_v25, %v453_v29  ;;  %v487_v19 = vsel %vm479_vm3, %v1255_v20, 0.0  ;;  %vm338_vm1 = vcmask 8192   ;;  %v375_v15 = vadd.f32 %v374_v58, %v373_v42 }
 0x207   :  { %v416_v63 = vadd.f32 %v415_v7, %v414_v47  ;;  %v488_v32 = vsel %vm480_vm9, %v1329_v56, 0.0  ;;  %v489_v48 = vsel %vm481_vm6, %v1311_v51, 0.0  ;;  %vm565_vm2 = vcmp.eq.s32.totalorder %v1090_v35, %v998_v8 }
 0x208   :  { %vm566_vm7 = vcmp.eq.s32.totalorder %v1090_v35, %v1006_v10  ;;  %v333_v1 = vadd.f32 %v332_v9, %v331_v2  ;;  %v457_v59 = vadd.f32 %v456_v30, %v455_v46  ;;  %v496_v57 = vadd.f32 %v1404_v26, %v1527_v43 }
 0x209   :  { %v497_v58 = vsel %vm316_vm15, %v1603_v54, 0.0  ;;  %v376_v13 = vrot.slane %v375_v15, 4  ;;  %v418_v7 = vadd.f32 %v417_v62, %v416_v63  ;;  %v460_v60 = vsel %vm316_vm15, %v446_v49, 0.0 }
 0x20a   :  { %v499_v33 = vsel %vm316_vm15, %v487_v19, 0.0  ;;  %vm567_vm10 = vcmp.eq.s32.totalorder %v1090_v35, %v1009_v11  ;;  %v334_v3 = vrot.slane %v333_v1, 2  ;;  %v459_v31 = vadd.f32 %v458_v4, %v457_v59 }
 0x20b   :  { %v498_v14 = vadd.f32 %v497_v58, %v496_v57  ;;  %v501_v2 = vsel %vm316_vm15, %v488_v32, 0.0  ;;  %v377_v29 = vadd.f32 %v376_v13, %v375_v15  ;;  %v419_v25 = vrot.slane %v418_v7, 4 }
 0x20c   :  { %v503_v26 = vsel %vm316_vm15, %v489_v48, 0.0  ;;  %v530_v43 = vsel %vm522_vm14, %v1255_v20, 0.0  ;;  %vm608_vm3 = vcmp.eq.s32.totalorder %v1095_v36, %v998_v8  ;;  %v335_v54 = vadd.f32 %v334_v3, %v333_v1 }
 0x20d   :  { %v461_v62 = vadd.f32 %v460_v60, %v459_v31  ;;  %v500_v42 = vadd.f32 %v499_v33, %v498_v14  ;;  %v531_v47 = vsel %vm523_vm11, %v1329_v56, 0.0  ;;  %vm609_vm8 = vcmp.eq.s32.totalorder %v1095_v36, %v1006_v10 }
 0x20e   :  { %vm610_vm0 = vcmp.eq.s32.totalorder %v1095_v36, %v1009_v11  ;;  %v378_v49 = vrot.slane %v377_v29, 2  ;;  %v420_v30 = vadd.f32 %v419_v25, %v418_v7  ;;  %v539_v9 = vadd.f32 %v1407_v27, %v1530_v44 }
 0x20f   :  { %v540_v46 = vsel %vm316_vm15, %v1609_v21, 0.0  ;;  %v336_v4 = vrot.slane %v335_v54, 1  ;;  %v462_v19 = vrot.slane %v461_v62, 4  ;;  %v502_v15 = vadd.f32 %v501_v2, %v500_v42 }
 0x210   :  { %v532_v63 = vsel %vm524_vm13, %v1311_v51, 0.0  ;;  %v379_v32 = vadd.f32 %v378_v49, %v377_v29  ;;  %v421_v48 = vrot.slane %v420_v30, 2  ;;  %v541_v1 = vadd.f32 %v540_v46, %v539_v9 }
 0x211   :  { %v542_v59 = vsel %vm316_vm15, %v530_v43, 0.0  ;;  %vm651_vm9 = vcmp.eq.s32.totalorder %v1100_v37, %v998_v8  ;;  %v337_v27 = vadd.f32 %v336_v4, %v335_v54  ;;  %v463_v44 = vadd.f32 %v462_v19, %v461_v62 }
 0x212   :  { %v504_v57 = vadd.f32 %v503_v26, %v502_v15  ;;  %v544_v21 = vsel %vm316_vm15, %v531_v47, 0.0  ;;  %vm652_vm6 = vcmp.eq.s32.totalorder %v1100_v37, %v1006_v10  ;;  %v380_v58 = vrot.slane %v379_v32, 1 }
 0x213   :  { %v422_v13 = vadd.f32 %v421_v48, %v420_v30  ;;  %v543_v34 = vadd.f32 %v542_v59, %v541_v1  ;;  %v546_v7 = vsel %vm316_vm15, %v532_v63, 0.0  ;;  %339 = vst.msk [vmem:[%s1969_s4] sm:$0x1] %vm338_vm1, %v337_v27  ;;  %v464_v60 = vrot.slane %v463_v44, 2 }
 0x214   :  { %v505_v33 = vrot.slane %v504_v57, 4  ;;  %v573_v3 = vsel %vm565_vm2, %v1255_v20, 0.0  ;;  %v574_v31 = vsel %vm566_vm7, %v1329_v56, 0.0  ;;  %vm653_vm5 = vcmp.eq.s32.totalorder %v1100_v37, %v1009_v11 }
 0x215   :  { %v381_v14 = vadd.f32 %v380_v58, %v379_v32  ;;  %v423_v2 = vrot.slane %v422_v13, 1  ;;  %v545_v29 = vadd.f32 %v544_v21, %v543_v34  ;;  %v582_v25 = vadd.f32 %v1410_v28, %v1533_v55 }
 0x216   :  { %vm694_vm12 = vcmp.eq.s32.totalorder %v1107_v38, %v998_v8  ;;  %v465_v26 = vadd.f32 %v464_v60, %v463_v44  ;;  %v506_v43 = vadd.f32 %v505_v33, %v504_v57  ;;  %v575_v54 = vsel %vm567_vm10, %v1311_v51, 0.0 }
 0x217   :  { %v583_v62 = vsel %vm316_vm15, %v1615_v22, 0.0  ;;  %vm695_vm4 = vcmp.eq.s32.totalorder %v1107_v38, %v1006_v10  ;;  %vm696_vm14 = vcmp.eq.s32.totalorder %v1107_v38, %v1009_v11  ;;  %382 = vst.msk [vmem:[%s1969_s4 + $0x1] sm:$0x1] %vm338_vm1, %v381_v14  ;;  %v424_v28 = vadd.f32 %v423_v2, %v422_v13 }
 0x218   :  { %v547_v55 = vadd.f32 %v546_v7, %v545_v29  ;;  %v584_v42 = vadd.f32 %v583_v62, %v582_v25  ;;  %v585_v35 = vsel %vm316_vm15, %v573_v3, 0.0  ;;  %v466_v47 = vrot.slane %v465_v26, 1 }
 0x219   :  { %v507_v49 = vrot.slane %v506_v43, 2  ;;  %v587_v22 = vsel %vm316_vm15, %v574_v31, 0.0  ;;  %v616_v30 = vsel %vm608_vm3, %v1255_v20, 0.0  ;;  %425 = vst.msk [vmem:[%s1969_s4 + $0x2] sm:$0x1] %vm338_vm1, %v424_v28  ;;  %v617_v4 = vsel %vm609_vm8, %v1329_v56, 0.0 }
 0x21a   :  { %v548_v9 = vrot.slane %v547_v55, 4  ;;  %v586_v46 = vadd.f32 %v585_v35, %v584_v42  ;;  %v618_v19 = vsel %vm610_vm0, %v1311_v51, 0.0  ;;  %v467_v15 = vadd.f32 %v466_v47, %v465_v26 }
 0x21b   :  { %v508_v63 = vadd.f32 %v507_v49, %v506_v43  ;;  %v625_v32 = vadd.f32 %v1413_v41, %v1536_v6  ;;  %v626_v48 = vsel %vm316_vm15, %v1623_v23, 0.0  ;;  %vm737_vm11 = vcmp.eq.s32.totalorder %v1112_v39, %v998_v8 }
 0x21c   :  { %vm738_vm13 = vcmp.eq.s32.totalorder %v1112_v39, %v1006_v10  ;;  %v549_v1 = vadd.f32 %v548_v9, %v547_v55  ;;  %v588_v59 = vadd.f32 %v587_v22, %v586_v46  ;;  %v589_v27 = vsel %vm316_vm15, %v575_v54, 0.0  ;;  %468 = vst.msk [vmem:[%s1969_s4 + $0x3] sm:$0x1] %vm338_vm1, %v467_v15 }
 0x21d   :  { %v628_v36 = vsel %vm316_vm15, %v616_v30, 0.0  ;;  %v509_v41 = vrot.slane %v508_v63, 1  ;;  %v627_v6 = vadd.f32 %v626_v48, %v625_v32  ;;  %v630_v23 = vsel %vm316_vm15, %v617_v4, 0.0 }
 0x21e   :  { %v659_v44 = vsel %vm651_vm9, %v1255_v20, 0.0  ;;  %vm739_vm2 = vcmp.eq.s32.totalorder %v1112_v39, %v1009_v11  ;;  %v550_v57 = vrot.slane %v549_v1, 2  ;;  %v590_v21 = vadd.f32 %v589_v27, %v588_v59 }
 0x21f   :  { %v632_v58 = vsel %vm316_vm15, %v618_v19, 0.0  ;;  %v660_v13 = vsel %vm652_vm6, %v1329_v56, 0.0  ;;  %v510_v34 = vadd.f32 %v509_v41, %v508_v63  ;;  %v629_v7 = vadd.f32 %v628_v36, %v627_v6 }
 0x220   :  { %v668_v60 = vadd.f32 %v1434_v45, %v1565_v61  ;;  %v669_v33 = vsel %vm316_vm15, %v1629_v24, 0.0  ;;  %vm780_vm7 = vcmp.eq.s32.totalorder %v1117_v40, %v998_v8  ;;  %vm781_vm10 = vcmp.eq.s32.totalorder %v1117_v40, %v1006_v10 }
 0x221   :  { %v551_v3 = vadd.f32 %v550_v57, %v549_v1  ;;  %v591_v31 = vrot.slane %v590_v21, 4  ;;  %v661_v14 = vsel %vm653_vm5, %v1311_v51, 0.0  ;;  %v671_v2 = vsel %vm316_vm15, %v659_v44, 0.0  ;;  %511 = vst.msk [vmem:[%s1969_s4 + $0x4] sm:$0x1] %vm338_vm1, %v510_v34 }
 0x222   :  { %v631_v45 = vadd.f32 %v630_v23, %v629_v7  ;;  %v670_v61 = vadd.f32 %v669_v33, %v668_v60  ;;  %v673_v24 = vsel %vm316_vm15, %v660_v13, 0.0  ;;  %v702_v29 = vsel %vm694_vm12, %v1255_v20, 0.0 }
 0x223   :  { %v552_v25 = vrot.slane %v551_v3, 1  ;;  %v592_v26 = vadd.f32 %v591_v31, %v590_v21  ;;  %v703_v37 = vsel %vm695_vm4, %v1329_v56, 0.0  ;;  %v704_v43 = vsel %vm696_vm14, %v1311_v51, 0.0 }
 0x224   :  { %v633_v54 = vadd.f32 %v632_v58, %v631_v45  ;;  %v672_v62 = vadd.f32 %v671_v2, %v670_v61  ;;  %v711_v28 = vadd.f32 %v1437_v52, %v1568_v12  ;;  %v712_v55 = vsel %vm316_vm15, %v1635_v17, 0.0 }
 0x225   :  { %v553_v42 = vadd.f32 %v552_v25, %v551_v3  ;;  %v593_v35 = vrot.slane %v592_v26, 2  ;;  %v675_v47 = vsel %vm316_vm15, %v661_v14, 0.0  ;;  %v714_v49 = vsel %vm316_vm15, %v702_v29, 0.0 }
 0x226   :  { %v634_v22 = vrot.slane %v633_v54, 4  ;;  %v674_v30 = vadd.f32 %v673_v24, %v672_v62  ;;  %v713_v9 = vadd.f32 %v712_v55, %v711_v28  ;;  %v716_v38 = vsel %vm316_vm15, %v703_v37, 0.0 }
 0x227   :  { %554 = vst.msk [vmem:[%s1969_s4 + $0x5] sm:$0x1] %vm338_vm1, %v553_v42  ;;  %v594_v52 = vadd.f32 %v593_v35, %v592_v26  ;;  %v718_v12 = vsel %vm316_vm15, %v704_v43, 0.0  ;;  %v745_v17 = vsel %vm737_vm11, %v1255_v20, 0.0  ;;  %v746_v46 = vsel %vm738_vm13, %v1329_v56, 0.0 }
 0x228   :  { %v635_v4 = vadd.f32 %v634_v22, %v633_v54  ;;  %v676_v19 = vadd.f32 %v675_v47, %v674_v30  ;;  %v715_v15 = vadd.f32 %v714_v49, %v713_v9  ;;  %v754_v63 = vadd.f32 %v1440_v53, %v1571_v5 }
 0x229   :  { %v595_v32 = vrot.slane %v594_v52, 1  ;;  %v747_v48 = vsel %vm739_vm2, %v1311_v51, 0.0  ;;  %v755_v1 = vsel %vm316_vm15, %v1641_v18, 0.0  ;;  %v757_v59 = vsel %vm316_vm15, %v745_v17, 0.0 }
 0x22a   :  { %v636_v27 = vrot.slane %v635_v4, 2  ;;  %v677_v36 = vrot.slane %v676_v19, 4  ;;  %v717_v41 = vadd.f32 %v716_v38, %v715_v15  ;;  %v756_v6 = vadd.f32 %v755_v1, %v754_v63 }
 0x22b   :  { %v596_v23 = vadd.f32 %v595_v32, %v594_v52  ;;  %v759_v44 = vsel %vm316_vm15, %v746_v46, 0.0  ;;  %v788_v53 = vsel %vm780_vm7, %v1255_v20, 0.0  ;;  %v789_v39 = vsel %vm781_vm10, %v1329_v56, 0.0 }
 0x22c   :  { %v637_v5 = vadd.f32 %v636_v27, %v635_v4  ;;  %v678_v18 = vadd.f32 %v677_v36, %v676_v19  ;;  %v719_v57 = vadd.f32 %v718_v12, %v717_v41  ;;  %v758_v21 = vadd.f32 %v757_v59, %v756_v6 }
 0x22d   :  { %597 = vst.msk [vmem:[%s1969_s4 + $0x6] sm:$0x1] %vm338_vm1, %v596_v23  ;;  %vm782_vm3 = vcmp.eq.s32.totalorder %v1117_v40, %v1009_v11  ;;  %v797_v8 = vadd.f32 %v1581_v16, %v1574_v0  ;;  %v798_v20 = vsel %vm316_vm15, %v1666_v50, 0.0  ;;  %v761_v34 = vsel %vm316_vm15, %v747_v48, 0.0 }
 0x22e   :  { %v638_v10 = vrot.slane %v637_v5, 1  ;;  %v679_v56 = vrot.slane %v678_v18, 2  ;;  %v720_v58 = vrot.slane %v719_v57, 4  ;;  %v760_v13 = vadd.f32 %v759_v44, %v758_v21 }
 0x22f   :  { %v799_v7 = vadd.f32 %v798_v20, %v797_v8  ;;  %v800_v60 = vsel %vm316_vm15, %v788_v53, 0.0  ;;  %v802_v33 = vsel %vm316_vm15, %v789_v39, 0.0  ;;  %v790_v0 = vsel %vm782_vm3, %v1311_v51, 0.0 }
 0x230   :  { %v639_v3 = vadd.f32 %v638_v10, %v637_v5  ;;  %v680_v31 = vadd.f32 %v679_v56, %v678_v18  ;;  %v721_v11 = vadd.f32 %v720_v58, %v719_v57  ;;  %v762_v40 = vadd.f32 %v761_v34, %v760_v13 }
 0x231   :  { %v801_v16 = vadd.f32 %v800_v60, %v799_v7  ;;  %v804_v25 = vsel %vm316_vm15, %v790_v0, 0.0 }
 0x232   :  { %640 = vst.msk [vmem:[%s1969_s4 + $0x7] sm:$0x1] %vm338_vm1, %v639_v3  ;;  %v681_v50 = vrot.slane %v680_v31, 1  ;;  %v722_v14 = vrot.slane %v721_v11, 2  ;;  %v763_v2 = vrot.slane %v762_v40, 4 }
 0x233   :  { %v803_v45 = vadd.f32 %v802_v33, %v801_v16 }
 0x234   :  { %v682_v61 = vadd.f32 %v681_v50, %v680_v31  ;;  %v723_v24 = vadd.f32 %v722_v14, %v721_v11  ;;  %v764_v29 = vadd.f32 %v763_v2, %v762_v40 }
 0x235   :  { %v805_v26 = vadd.f32 %v804_v25, %v803_v45 }
 0x236   :  { %683 = vst.msk [vmem:[%s1969_s4 + $0x8] sm:$0x1] %vm338_vm1, %v682_v61  ;;  %v724_v51 = vrot.slane %v723_v24, 1  ;;  %v765_v37 = vrot.slane %v764_v29, 2 }
 0x237   :  { %v806_v43 = vrot.slane %v805_v26, 4 }
 0x238   :  { %v725_v54 = vadd.f32 %v724_v51, %v723_v24  ;;  %v766_v62 = vadd.f32 %v765_v37, %v764_v29 }
 0x239   :  { %v807_v28 = vadd.f32 %v806_v43, %v805_v26 }
 0x23a   :  { %726 = vst.msk [vmem:[%s1969_s4 + $0x9] sm:$0x1] %vm338_vm1, %v725_v54  ;;  %v767_v55 = vrot.slane %v766_v62, 1 }
 0x23b   :  { %v808_v42 = vrot.slane %v807_v28, 2 }
 0x23c   :  { %v768_v35 = vadd.f32 %v767_v55, %v766_v62 }
 0x23d   :  { %v809_v47 = vadd.f32 %v808_v42, %v807_v28 }
 0x23e   :  { %769 = vst.msk [vmem:[%s1969_s4 + $0xa] sm:$0x1] %vm338_vm1, %v768_v35 }
 0x23f   :  { %v810_v49 = vrot.slane %v809_v47, 1 }
 0x241   :  { %v811_v22 = vadd.f32 %v810_v49, %v809_v47 }
 0x243   :  { %812 = vst.msk [vmem:[%s1969_s4 + $0xb] sm:$0x1] %vm338_vm1, %v811_v22 }

</bundles_post_ra>
